<compile_context>
chip_gen: v6e
topology: v6e:2x2x1
jax: 0.10.0
libtpu: 0.0.40
codegen_flags: <defaults>
</compile_context>

<pallas_src>
import functools

import jax
import jax.numpy as jnp
from jax import lax
from jax.experimental import pallas as pl
from jax.experimental.pallas import tpu as pltpu

_LN_EPS = 1e-6  # matches torch.nn.LayerNorm(width1, eps=1e-06)
_LANE = 128


def _round_up(a, m):
    return ((a + m - 1) // m) * m


def _deepsets_kernel(x_ref, w1_ref, b1_ref, wf_ref, bf_ref, out_ref, acc_ref,
                     *, n_set, chunk_b):
    """One batch tile.

    x_ref   : (tile_b * n_set, Cin)   lin1 input rows, batch-major
    w1_ref  : (Cin, W1)               lin1 weight (compute dtype)
    b1_ref  : (1, W1)      f32        lin1 bias
    wf_ref  : (W1, Cout)   f32        folded  diag(gamma) @ W2 @ Wc / N
    bf_ref  : (1, Cout)    f32        folded  beta@W2@Wc + b2@Wc + bc
    out_ref : (tile_b, Cout)
    acc_ref : (tile_b, W1) f32 scratch  — per-batch set-sum of LN(relu(lin1))
    """
    w1 = w1_ref[...]          # hoisted out of the chunk loop (stays resident)
    b1 = b1_ref[...]          # (1, W1) f32; the add does a cheap sublane bcast
    wd = w1.shape[1]
    inv_w = 1.0 / wd
    rows = chunk_b * n_set    # rows per chunk (static)
    n_chunks = acc_ref.shape[0] // chunk_b

    def chunk_body(c, carry):
        r0 = pl.multiple_of(c * rows, rows)
        xc = x_ref[pl.ds(r0, rows), :]                           # (rows, Cin)
        # lin1 (+bias) on the MXU with f32 accumulation; ReLU on the VPU.
        h = jnp.dot(xc, w1, preferred_element_type=jnp.float32) + b1
        h = jnp.maximum(h, 0.0)                                  # (rows, W1) f32
        # LayerNorm over features (eps=1e-6); affine is folded into wf/bf.
        mu = jnp.sum(h, axis=-1, keepdims=True) * inv_w
        ctr = h - mu
        var = jnp.sum(ctr * ctr, axis=-1, keepdims=True) * inv_w
        hn = ctr * lax.rsqrt(var + _LN_EPS)                      # (rows, W1) f32
        # Sum over the set dimension (layout-free sublane reduce when
        # n_set % 8 == 0).
        # TODO(synk): for n_set not a multiple of 8, a segment-indicator matmul
        #             on the (idle) MXU would avoid the relayout this implies.
        s = jnp.sum(hn.reshape(chunk_b, n_set, wd), axis=1)      # (chunk_b, W1)
        b0 = pl.multiple_of(c * chunk_b, chunk_b)
        acc_ref[pl.ds(b0, chunk_b), :] = s
        return carry

    lax.fori_loop(0, n_chunks, chunk_body, 0)

    # Fused lin2 + mean readout + classifier: one tiny matmul per tile.
    out = jnp.dot(acc_ref[...], wf_ref[...], preferred_element_type=jnp.float32)
    out_ref[...] = (out + bf_ref[...]).astype(out_ref.dtype)


def _vmem_limit_bytes():
    """Generation-aware scoped-VMEM limit (~96 MiB v5e/v6e, ~48 MiB v7x)."""
    try:
        cap = int(pltpu.get_tpu_info().vmem_capacity_bytes)
    except Exception:
        cap = 64 * 1024 * 1024  # conservative v7x per-TC floor
    return max(32 * 1024 * 1024, (cap * 3) // 4)


def _choose_tiling(B, N, itemsize_x, vmem_limit):
    """Returns (chunk_b, tile_b): batches per in-kernel chunk / per grid step."""
    # ~1024 rows of f32 temporaries per chunk (< ~1.5 MiB at W1 <= 128 lanes).
    chunk_b = max(8, _round_up(max(1, 1024 // N), 8))
    if B <= chunk_b:
        return B, B  # single full-extent block; block dims == array dims is legal
    # VMEM budget (lane-padded): x tile double-buffered + f32 accumulator,
    # leaving headroom for chunk temporaries, weights and compiler scratch.
    x_bytes_per_batch = 2 * N * _LANE * itemsize_x
    acc_bytes_per_batch = _LANE * 4
    budget = max(vmem_limit // 2 - 6 * 1024 * 1024, 2 * 1024 * 1024)
    tb = budget // (x_bytes_per_batch + acc_bytes_per_batch)
    tb = min(tb, _round_up(B, chunk_b))
    if B >= 2 * chunk_b:
        # Keep >= 2 grid steps so ("parallel",) shards across v7x's 2 TensorCores.
        tb = min(tb, _round_up(pl.cdiv(B, 2), chunk_b))
    tb = max(chunk_b, (tb // chunk_b) * chunk_b)
    return chunk_b, tb


def deepsets_forward(x, params, *, readout="mean", training=False,
                     random_sign=False, compute_dtype=jnp.bfloat16):
    """x: (B, N, C_in). params: w1/b1, gamma/beta, w2/b2, wc/bc (weights (in, out))."""
    if readout != "mean" or training or random_sign:
        # TODO(synk): the algebraic folding below is only exact for inference
        # with readout='mean'; other configurations need a different kernel.
        raise NotImplementedError(
            "deepsets_forward supports inference with readout='mean', "
            "dropout off, random_sign=False only")

    B, N, Cin = x.shape
    f32 = jnp.float32
    hi = lax.Precision.HIGHEST

    w1 = jnp.asarray(params["w1"])
    b1 = jnp.asarray(params["b1"], f32).reshape(1, -1)
    gamma = jnp.asarray(params["gamma"], f32).reshape(-1)
    beta = jnp.asarray(params["beta"], f32).reshape(-1)
    w2 = jnp.asarray(params["w2"], f32)
    b2 = jnp.asarray(params["b2"], f32).reshape(1, -1)
    wc = jnp.asarray(params["wc"], f32)
    bc = jnp.asarray(params["bc"], f32).reshape(1, -1)
    W1 = w1.shape[1]
    Cout = wc.shape[1]

    # ---- exact algebraic folding (inference, mean readout) -------------------
    w2c = jnp.matmul(w2, wc, precision=hi)                       # (W1, Cout)
    wf = (gamma[:, None] * w2c) / float(N)                       # (W1, Cout)
    bf = (jnp.matmul(beta[None, :], w2c, precision=hi)
          + jnp.matmul(b2, wc, precision=hi) + bc)               # (1, Cout)

    # ---- tiling ----------------------------------------------------------------
    vmem_limit = _vmem_limit_bytes()
    itemsize = jnp.dtype(compute_dtype).itemsize
    chunk_b, tile_b = _choose_tiling(B, N, itemsize, vmem_limit)

    # ---- x preparation: free (B,N,Cin)->(B*N,Cin) reshape + bf16 cast ---------
    x2 = x.reshape(B * N, Cin).astype(compute_dtype)
    w1c = w1.astype(compute_dtype)

    b_pad = _round_up(B, tile_b)
    if b_pad != B:
        # TODO(synk): a masked last tile would avoid re-materializing x here.
        pad_rows = (b_pad - B) * N
        x2 = jnp.concatenate(
            [x2, jnp.zeros((pad_rows, Cin), x2.dtype)], axis=0)
    mrows = tile_b * N
    grid = (b_pad // tile_b,)

    kernel = functools.partial(_deepsets_kernel, n_set=N, chunk_b=chunk_b)
    out = pl.pallas_call(
        kernel,
        out_shape=jax.ShapeDtypeStruct((b_pad, Cout), jnp.float32),
        grid_spec=pltpu.PrefetchScalarGridSpec(
            num_scalar_prefetch=0,
            grid=grid,
            in_specs=[
                pl.BlockSpec((mrows, Cin), lambda i: (i, 0)),    # x tile
                pl.BlockSpec((Cin, W1), lambda i: (0, 0)),       # W1 (resident)
                pl.BlockSpec((1, W1), lambda i: (0, 0)),         # b1
                pl.BlockSpec((W1, Cout), lambda i: (0, 0)),      # folded Wf
                pl.BlockSpec((1, Cout), lambda i: (0, 0)),       # folded bf
            ],
            out_specs=pl.BlockSpec((tile_b, Cout), lambda i: (i, 0)),
            scratch_shapes=[pltpu.VMEM((tile_b, W1), jnp.float32)],
        ),
        compiler_params=pltpu.CompilerParams(
            dimension_semantics=("parallel",),
            vmem_limit_bytes=int(vmem_limit),
        ),
    )(x2, w1c, b1, wf, bf)

    return out[:B]


def _mm(a, b):
    return jnp.matmul(a, b, precision=lax.Precision.HIGHEST)


def _reference(x, p):
    """Pure-JAX reference following the original (unfused) module math."""
    h = jnp.maximum(_mm(x, p["w1"]) + p["b1"], 0.0)
    mean = h.mean(-1, keepdims=True)
    var = ((h - mean) ** 2).mean(-1, keepdims=True)
    h = (h - mean) / jnp.sqrt(var + _LN_EPS) * p["gamma"] + p["beta"]
    z = _mm(h, p["w2"]) + p["b2"]
    r = z.mean(axis=1)
    return _mm(r, p["wc"]) + p["bc"]


def _bf16_round(a):
    return a.astype(jnp.bfloat16).astype(jnp.float32)


if __name__ == "__main__":
    # Small shapes consistent with the module's forward:
    B, N = 2, 8                       # batch, set size
    in_channels = 16
    width1, width2 = 32, 32
    out_channels = 4

    key = jax.random.PRNGKey(0)
    ks = jax.random.split(key, 8)

    def uinit(k, shape, fan_in):
        bound = 1.0 / jnp.sqrt(fan_in)
        return jax.random.uniform(k, shape, jnp.float32, -bound, bound)

    params = {
        # Linear weights stored as (in_dim, out_dim) — transposed vs. PyTorch.
        "w1": uinit(ks[0], (in_channels, width1), in_channels),
        "b1": uinit(ks[1], (1, width1), in_channels),
        "gamma": jnp.ones((1, width1), jnp.float32),    # LayerNorm weight init
        "beta": jnp.zeros((1, width1), jnp.float32),    # LayerNorm bias init
        "w2": uinit(ks[2], (width1, width2), width1),
        "b2": uinit(ks[3], (1, width2), width1),
        "wc": uinit(ks[4], (width2, out_channels), width2),
        "bc": uinit(ks[5], (1, out_channels), width2),
    }
    params_bf = dict(params, w1=_bf16_round(params["w1"]))

    x = jax.random.normal(ks[6], (B, N, in_channels), jnp.float32)

    # 1) f32 compute path vs. the unfused reference.
    out_f32 = jax.block_until_ready(
        deepsets_forward(x, params, compute_dtype=jnp.float32))
    ref = _reference(x, params)
    assert out_f32.shape == (B, out_channels)
    assert jnp.allclose(out_f32, ref, atol=2e-3, rtol=2e-3), "f32 path mismatch"

    # 2) default bf16-input path vs. reference on bf16-rounded inputs.
    out_bf = jax.block_until_ready(deepsets_forward(x, params))
    ref_bf = _reference(_bf16_round(x), params_bf)
    assert jnp.allclose(out_bf, ref_bf, atol=2e-3, rtol=2e-3), "bf16 path mismatch"

    # 3) larger batch: exercises multi-tile grid, in-kernel chunk loop, padding.
    B2 = 384
    x_big = jax.random.normal(ks[7], (B2, N, in_channels), jnp.float32)
    out_big = jax.block_until_ready(deepsets_forward(x_big, params))
    ref_big = _reference(_bf16_round(x_big), params_bf)
    assert out_big.shape == (B2, out_channels)
    assert jnp.allclose(out_big, ref_big, atol=2e-3, rtol=2e-3), "large-B mismatch"

    print("KERNEL_OK")
</pallas_src>

<mosaic_0001>
module attributes {stable_mosaic.version = 11 : i64} {
  func.func @_deepsets_kernel(%arg0: i32, %arg1: memref<16x16xf32, #tpu.memory_space<vmem>>, %arg2: memref<16x32xf32, #tpu.memory_space<vmem>>, %arg3: memref<1x32xf32, #tpu.memory_space<vmem>>, %arg4: memref<32x4xf32, #tpu.memory_space<vmem>>, %arg5: memref<1x4xf32, #tpu.memory_space<vmem>>, %arg6: memref<2x4xf32, #tpu.memory_space<vmem>>, %arg7: memref<2x32xf32, #tpu.memory_space<vmem>>) attributes {dimension_semantics = [#tpu.dimension_semantics<parallel>], iteration_bounds = array<i64: 1>, scalar_prefetch = 0 : i64, scratch_operands = 1 : i64, tpu.core_type = #tpu.core_type<tc>, window_params = [{transform_indices = @transform_0, window_bounds = array<i64: 16, 16>}, {pipeline_mode = #tpu.pipeline_mode<synchronous>, transform_indices = @transform_1, window_bounds = array<i64: 16, 32>}, {pipeline_mode = #tpu.pipeline_mode<synchronous>, transform_indices = @transform_2, window_bounds = array<i64: 1, 32>}, {pipeline_mode = #tpu.pipeline_mode<synchronous>, transform_indices = @transform_3, window_bounds = array<i64: 32, 4>}, {pipeline_mode = #tpu.pipeline_mode<synchronous>, transform_indices = @transform_4, window_bounds = array<i64: 1, 4>}, {transform_indices = @transform_5, window_bounds = array<i64: 2, 4>}]} {
    %c0 = arith.constant 0 : index
    %c0_0 = arith.constant 0 : index
    %0 = vector.load %arg2[%c0, %c0_0] : memref<16x32xf32, #tpu.memory_space<vmem>>, vector<16x32xf32>
    %c0_1 = arith.constant 0 : index
    %c0_2 = arith.constant 0 : index
    %1 = vector.load %arg3[%c0_1, %c0_2] : memref<1x32xf32, #tpu.memory_space<vmem>>, vector<1x32xf32>
    %c0_i32 = arith.constant 0 : i32
    %c16_i32 = arith.constant 16 : i32
    %2 = arith.muli %c0_i32, %c16_i32 : i32
    %3 = tpu.assume_multiple %2, 16 : i32
    %4 = arith.index_cast %3 : i32 to index
    %c0_3 = arith.constant 0 : index
    %5 = vector.load %arg1[%4, %c0_3] : memref<16x16xf32, #tpu.memory_space<vmem>>, vector<16x16xf32>
    %cst = arith.constant dense<0.000000e+00> : vector<16x32xf32>
    %6 = tpu.matmul %5, %0, %cst {dimension_numbers = #tpu.dot_dimension_numbers<[1], [0], [0], [1], [0, 0, 1, 1], [], []>} : vector<16x16xf32>, vector<16x32xf32>, vector<16x32xf32> -> vector<16x32xf32>
    %7 = vector.broadcast %1 : vector<1x32xf32> to vector<16x32xf32>
    %8 = arith.addf %6, %7 : vector<16x32xf32>
    %cst_4 = arith.constant 0.000000e+00 : f32
    %9 = vector.broadcast %cst_4 : f32 to vector<16x32xf32>
    %10 = arith.maximumf %8, %9 : vector<16x32xf32>
    %cst_5 = arith.constant dense<0.000000e+00> : vector<16xf32>
    %11 = vector.multi_reduction <add>, %10, %cst_5 [1] : vector<16x32xf32> to vector<16xf32>
    %12 = vector.shape_cast %11 : vector<16xf32> to vector<16x1xf32>
    %cst_6 = arith.constant 3.125000e-02 : f32
    %13 = vector.broadcast %cst_6 : f32 to vector<16x1xf32>
    %14 = arith.mulf %12, %13 : vector<16x1xf32>
    %15 = vector.broadcast %14 : vector<16x1xf32> to vector<16x32xf32>
    %16 = arith.subf %10, %15 : vector<16x32xf32>
    %17 = arith.mulf %16, %16 : vector<16x32xf32>
    %cst_7 = arith.constant dense<0.000000e+00> : vector<16xf32>
    %18 = vector.multi_reduction <add>, %17, %cst_7 [1] : vector<16x32xf32> to vector<16xf32>
    %19 = vector.shape_cast %18 : vector<16xf32> to vector<16x1xf32>
    %cst_8 = arith.constant 3.125000e-02 : f32
    %20 = vector.broadcast %cst_8 : f32 to vector<16x1xf32>
    %21 = arith.mulf %19, %20 : vector<16x1xf32>
    %cst_9 = arith.constant 9.99999997E-7 : f32
    %22 = vector.broadcast %cst_9 : f32 to vector<16x1xf32>
    %23 = arith.addf %21, %22 : vector<16x1xf32>
    %24 = math.rsqrt %23 : vector<16x1xf32>
    %25 = vector.broadcast %24 : vector<16x1xf32> to vector<16x32xf32>
    %26 = arith.mulf %16, %25 : vector<16x32xf32>
    %27 = vector.shape_cast %26 : vector<16x32xf32> to vector<2x8x32xf32>
    %cst_10 = arith.constant dense<0.000000e+00> : vector<2x32xf32>
    %28 = vector.multi_reduction <add>, %27, %cst_10 [1] : vector<2x8x32xf32> to vector<2x32xf32>
    %c2_i32 = arith.constant 2 : i32
    %29 = arith.muli %c0_i32, %c2_i32 : i32
    %30 = tpu.assume_multiple %29, 2 : i32
    %31 = arith.index_cast %30 : i32 to index
    %c0_11 = arith.constant 0 : index
    %32 = vector.load %arg7[%31, %c0_11] : memref<2x32xf32, #tpu.memory_space<vmem>>, vector<2x32xf32>
    tpu.vector_store %arg7[%31, %c0_11], %28 {strides = array<i32>} : memref<2x32xf32, #tpu.memory_space<vmem>>, vector<2x32xf32>,
    %c1_i32 = arith.constant 1 : i32
    %c0_12 = arith.constant 0 : index
    %c0_13 = arith.constant 0 : index
    %33 = vector.load %arg7[%c0_12, %c0_13] : memref<2x32xf32, #tpu.memory_space<vmem>>, vector<2x32xf32>
    %c0_14 = arith.constant 0 : index
    %c0_15 = arith.constant 0 : index
    %34 = vector.load %arg4[%c0_14, %c0_15] : memref<32x4xf32, #tpu.memory_space<vmem>>, vector<32x4xf32>
    %cst_16 = arith.constant dense<0.000000e+00> : vector<2x4xf32>
    %35 = tpu.matmul %33, %34, %cst_16 {dimension_numbers = #tpu.dot_dimension_numbers<[1], [0], [0], [1], [0, 0, 1, 1], [], []>} : vector<2x32xf32>, vector<32x4xf32>, vector<2x4xf32> -> vector<2x4xf32>
    %c0_17 = arith.constant 0 : index
    %c0_18 = arith.constant 0 : index
    %36 = vector.load %arg5[%c0_17, %c0_18] : memref<1x4xf32, #tpu.memory_space<vmem>>, vector<1x4xf32>
    %37 = vector.broadcast %36 : vector<1x4xf32> to vector<2x4xf32>
    %38 = arith.addf %35, %37 : vector<2x4xf32>
    %c0_19 = arith.constant 0 : index
    %c0_20 = arith.constant 0 : index
    %39 = vector.load %arg6[%c0_19, %c0_20] : memref<2x4xf32, #tpu.memory_space<vmem>>, vector<2x4xf32>
    tpu.vector_store %arg6[%c0_19, %c0_20], %38 {strides = array<i32>} : memref<2x4xf32, #tpu.memory_space<vmem>>, vector<2x4xf32>,
    return
  }
  func.func @transform_0(%arg0: i32) -> (i32, i32) {
    %c0_i32 = arith.constant 0 : i32
    %c0_i32_0 = arith.constant 0 : i32
    return %arg0, %c0_i32 : i32, i32
  }
  func.func @transform_1(%arg0: i32) -> (i32, i32) {
    %c0_i32 = arith.constant 0 : i32
    %c0_i32_0 = arith.constant 0 : i32
    %c0_i32_1 = arith.constant 0 : i32
    return %c0_i32, %c0_i32_0 : i32, i32
  }
  func.func @transform_2(%arg0: i32) -> (i32, i32) {
    %c0_i32 = arith.constant 0 : i32
    %c0_i32_0 = arith.constant 0 : i32
    %c0_i32_1 = arith.constant 0 : i32
    return %c0_i32, %c0_i32_0 : i32, i32
  }
  func.func @transform_3(%arg0: i32) -> (i32, i32) {
    %c0_i32 = arith.constant 0 : i32
    %c0_i32_0 = arith.constant 0 : i32
    %c0_i32_1 = arith.constant 0 : i32
    return %c0_i32, %c0_i32_0 : i32, i32
  }
  func.func @transform_4(%arg0: i32) -> (i32, i32) {
    %c0_i32 = arith.constant 0 : i32
    %c0_i32_0 = arith.constant 0 : i32
    %c0_i32_1 = arith.constant 0 : i32
    return %c0_i32, %c0_i32_0 : i32, i32
  }
  func.func @transform_5(%arg0: i32) -> (i32, i32) {
    %c0_i32 = arith.constant 0 : i32
    %c0_i32_0 = arith.constant 0 : i32
    return %arg0, %c0_i32 : i32, i32
  }
}

</mosaic_0001>

<bundles_post_ra>
// kernel: tpu_custom_call.1
= control target key start
LH: loop header
LB: loop body
LE: loop exit
PB: predicated region body
PF: predicated region fallthrough
CT: control target
= control target key end

     0   :  { %vm32_vm0 = vcmask 130048   ;;  %s399_s0 = inlined_call_operand.vmem [shape: f32[16,16], index: 0, kind: input, shape index: {}]   ;;  %s400_s1 = inlined_call_operand.vmem [shape: f32[16,32], index: 1, kind: input, shape index: {}]   ;;  %s401_s2 = inlined_call_operand.vmem [shape: f32[1,32], index: 2, kind: input, shape index: {}]   ;;  %s402_s3 = inlined_call_operand.vmem [shape: f32[32,4], index: 3, kind: input, shape index: {}]   ;;  %s403_s4 = inlined_call_operand.vmem [shape: f32[1,4], index: 4, kind: input, shape index: {}]   ;;  %s404_s5 = inlined_call_operand.hbm [shape: f32[2,4], index: 5, kind: output, shape index: {}]  }
   0x1   :  { %v22_v0 = vld [vmem:[%s400_s1 + $0x8] sm:$0xff]  ;;  %v21_v1 = vld [vmem:[%s400_s1] sm:$0xff] }
   0x2   :  { %v24_v2 = vld [vmem:[%s399_s0] sm:$0xff]  ;;  %279 = vmatprep.subr.mxu0 %v22_v0 }
   0x3   :  { %283 = vmatprep.mubr.msk.f32.mxu0 %vm32_vm0, %v24_v2 }
   0x4   :  { %10 = vsyncpa [#allocation4], 0  ;;  %280 = vmatpush3.msra.mxu0 %v22_v0  ;;  %v25_v3 = vld [vmem:[%s399_s0 + $0x8] sm:$0xff]  ;;  %v265_v5 = vld [vmem:[%s401_s2] ss:$0 sm:$0xff]  ;;  %vm116_vm1 = vcmask 261120  }
   0x5   :  { %281 = vmatprep.subr.mxu0 %v21_v1  ;;  %v326_v23 = vmov 0.0   ;;  %v168_v24 = vld [vmem:[%s402_s3 + $0x18] sm:$0xff]  ;;  %v167_v25 = vld [vmem:[%s402_s3 + $0x10] sm:$0xff]  ;;  %vm327_vm2 = vmmov 0   ;;  %v166_v26 = vld [vmem:[%s402_s3 + $0x8] sm:$0xff]  ;;  %vm159_vm3 = vcmask 1041409  }
   0x6   :  { %282 = vmatpush3.msra.mxu0 %v21_v1  ;;  %286 = vmatprep.subr.mxu1 %v326_v23  ;;  %v165_v27 = vld [vmem:[%s402_s3] sm:$0xff]  ;;  %vm162_vm4 = vcmask 254976   ;;  %s328_s9 = smov [#allocation3]   ;;  %vm249_vm5 = vcmask 25600  }
   0x7   :  { %284 = vmatmul.mubr.msk.f32.vlgmr.msra.gmra.mxu0 %vm32_vm0, %v25_v3  ;;  %287 = vmatpush3.msra.mxu1 %v168_v24  ;;  %v268_v54 = vld [vmem:[%s403_s4] ss:$0 sm:$0xff]  ;;  %s257_s10 = sshll.u32 %s328_s9, 4  ;;  %s258_s10 = int_to_ptr.vmem [resolvable:$true] %s257_s10 }
   0x8   :  { %294 = vmatprep.mubr.msk.f32.mxu1 %vm327_vm2, %v326_v23  ;;  %288 = vmatprep.subr.mxu1 %v326_v23  ;;  %s304_s11 = scalar_lea.vmem %s258_s10, 32  ;;  %p309_p1 = scmp.lt.s32.totalorder %s258_s10, %s258_s10 }
   0x9   :  { %289 = vmatpush3.msra.mxu1 %v167_v25  ;;  %p305_p0 = scmp.ne.s32.totalorder %s258_s10, %s304_s11  ;;  %p310_p2 = scmp.lt.s32.totalorder %s304_s11, %s304_s11 }
   0xa   :  { %290 = vmatprep.subr.mxu1 %v326_v23 }
   0xb   :  { %291 = vmatpush3.msra.mxu1 %v166_v26  ;;  %p311_p3 = por %p310_p2, %p309_p1 }
   0xc   :  { %292 = vmatprep.subr.mxu1 %v326_v23 }
   0xd   :  { %293 = vmatpush3.msra.mxu1 %v165_v27  ;;  %p312_p4 = pnand %p311_p3, %p305_p0 }
  0xc7   :  { %v285_v4 = vpop.f32.mrf.mxu0 }
  0xc8   :  { %v111_v7 = vadd.f32 %v285_v4, %v265_v5 }
  0xc9   :  { %v105_v6 = vpop.f32.mrf.mxu0 }
  0xca   :  { %v106_v8 = vadd.f32 %v265_v5, %v105_v6  ;;  %v115_v10 = vmax.f32 %v111_v7, 0.0 }
  0xcc   :  { %v114_v9 = vmax.f32 %v106_v8, 0.0  ;;  %v120_v12 = vsel %vm116_vm1, %v115_v10, 0.0 }
  0xce   :  { %v117_v11 = vsel %vm116_vm1, %v114_v9, 0.0 }
  0xcf   :  { %118 = vadd.xlane.f32.xlu0 %v117_v11 }
  0xd3   :  { %121 = vadd.xlane.f32.xlu0 %v120_v12 }
 0x158   :  { %v119_v13 = vpop.xlane.xlu0 %118 }
 0x159   :  { %v123_v14 = vmul.f32 0.03125, %v119_v13 }
 0x15b   :  { %v125_v15 = vsub.f32 %v114_v9, %v123_v14 }
 0x15c   :  { %v122_v16 = vpop.xlane.xlu0 %121 }
 0x15d   :  { %v124_v17 = vmul.f32 0.03125, %v122_v16  ;;  %v127_v18 = vmul.f32 %v125_v15, %v125_v15 }
 0x15f   :  { %v126_v19 = vsub.f32 %v115_v10, %v124_v17  ;;  %v129_v20 = vsel %vm116_vm1, %v127_v18, 0.0 }
 0x160   :  { %130 = vadd.xlane.f32.xlu1 %v129_v20 }
 0x161   :  { %v128_v21 = vmul.f32 %v126_v19, %v126_v19 }
 0x163   :  { %v132_v22 = vsel %vm116_vm1, %v128_v21, 0.0 }
 0x164   :  { %133 = vadd.xlane.f32.xlu1 %v132_v22 }
 0x1e9   :  { %v131_v28 = vpop.xlane.xlu1 %130 }
 0x1ea   :  { %v135_v29 = vmul.f32 0.03125, %v131_v28 }
 0x1ec   :  { %v137_v30 = vadd.f32 1e-06, %v135_v29 }
 0x1ed   :  { %v134_v31 = vpop.xlane.xlu1 %133 }
 0x1ee   :  { %300 = vrsqrt.f32 %v137_v30  ;;  %v136_v32 = vmul.f32 0.03125, %v134_v31 }
 0x1f0   :  { %v138_v33 = vadd.f32 1e-06, %v136_v32 }
 0x1f2   :  { %302 = vrsqrt.f32 %v138_v33 }
 0x1fb   :  { %v301_v34 = vpop.eup %300 }
 0x1fc   :  { %v141_v35 = vmul.f32 %v301_v34, %v125_v15 }
 0x1fe   :  { %v143_v36 = vsel %vm116_vm1, %v141_v35, 0.0 }
 0x1ff   :  { %v303_v37 = vpop.eup %302  ;;  %v144_v38 = vrot.slane %v143_v36, 4 }
 0x200   :  { %v142_v39 = vmul.f32 %v303_v37, %v126_v19 }
 0x201   :  { %v145_v40 = vadd.f32 %v144_v38, %v143_v36 }
 0x202   :  { %v150_v41 = vsel %vm116_vm1, %v142_v39, 0.0 }
 0x203   :  { %v146_v42 = vrot.slane %v145_v40, 2  ;;  %v151_v43 = vrot.slane %v150_v41, 4 }
 0x205   :  { %v147_v44 = vadd.f32 %v146_v42, %v145_v40  ;;  %v152_v45 = vadd.f32 %v151_v43, %v150_v41 }
 0x207   :  { %v153_v46 = vrot.slane %v152_v45, 2  ;;  %v148_v47 = vrot.slane %v147_v44, 1 }
 0x209   :  { %v154_v48 = vadd.f32 %v153_v46, %v152_v45  ;;  %v149_v50 = vadd.f32 %v148_v47, %v147_v44 }
 0x20b   :  { %v155_v49 = vrot.slane %v154_v48, 1 }
 0x20d   :  { %v156_v51 = vadd.f32 %v155_v49, %v154_v48 }
 0x20f   :  { %v160_v52 = vsel %vm159_vm3, %v156_v51, %v149_v50 }
 0x210   :  { %163 = vst.msk [vmem:[#allocation2] sm:$0x3] %vm162_vm4, %v160_v52 }
 0x217   :  { %v164_v53 = vld [vmem:[#allocation2] sm:$0x3] }
 0x218   :  { %295 = vmatmul.mubr.msk.f32.vlgmr.msra.gmra.mxu1 %vm116_vm1, %v164_v53 }
 0x2d8   :  { %v245_v55 = vpop.f32.mrf.mxu1 }
 0x2d9   :  { %v246_v56 = vadd.f32 %v268_v54, %v245_v55 }
 0x2da   :  { %v296_v57 = vpop.f32.mrf.mxu1 }
 0x2db   :  { %250 = vst.msk [vmem:[#allocation3] sm:$0x3] %vm249_vm5, %v246_v56 }
 0x2dc   :  { %315 = shalt.err (!%p312_p4)
}
 0x2dd   :  { %260 = dma.vmem_to_hbm [thread:$0]  %s258_s10, 32, %s404_s5, [#allocation4]  }
 0x2de   :  { %324 = dma.done.wait [#allocation4], 32  }
 0x2df   :  { %325 = vsyncadd [#allocation4], 4294967264 }
 0x2e0   :  { %264 = vsyncpa [#allocation4], 1 }

</bundles_post_ra>
